<compile_context>
chip_gen: v5e
topology: v5e:2x2
jax: 0.10.0
libtpu: 0.0.40
codegen_flags: <defaults>
</compile_context>

<pallas_src>
import functools

import jax
import jax.numpy as jnp
from jax.experimental import pallas as pl
from jax.experimental.pallas import tpu as pltpu


_SEQ_TILE = 256  # pooled width = 128 lanes: minimum lane-dense output block


def _avgpool1d_kernel(x_ref, o_ref, *, tl, tl_out, seq_len, needs_mask):
    # x_ref: (TR, TL)   o_ref: (TR, TL_OUT)
    x = x_ref[...]
    if needs_mask:
        # Ragged tail along the sequence axis: zero out-of-range columns so
        # undefined padding data can never reach the MXU (0 * NaN hazard).
        j = pl.program_id(1)
        col = j * tl + jax.lax.broadcasted_iota(jnp.int32, x.shape, 1)
        x = jnp.where(col < seq_len, x, jnp.zeros_like(x))

    # Constant pooling matrix, built in VMEM each step (cheap VPU work, hidden
    # under the block DMA): pool[2i, i] = pool[2i+1, i] = 0.5, else 0.
    rows = jax.lax.broadcasted_iota(jnp.int32, (tl, tl_out), 0)
    cols = jax.lax.broadcasted_iota(jnp.int32, (tl, tl_out), 1)
    pool = jnp.where((rows == 2 * cols) | (rows == 2 * cols + 1),
                     0.5, 0.0).astype(x.dtype)

    acc = jnp.dot(x, pool, preferred_element_type=jnp.float32)
    o_ref[...] = acc.astype(o_ref.dtype)


def _choose_seq_tiling(L):
    """Returns (tl, tl_out, n_seq_blocks, needs_mask)."""
    L_out = L // 2
    if L % _SEQ_TILE == 0 and L // _SEQ_TILE >= 2:
        return _SEQ_TILE, _SEQ_TILE // 2, L // _SEQ_TILE, False
    if L <= 512:
        # Small sequence: one full-extent block (legal for any size, pool matrix
        # stays <= 512x256).
        return L, L_out, 1, False
    # Large, non-256-multiple L: tile at 256 and mask the ragged tail in-kernel.
    return _SEQ_TILE, _SEQ_TILE // 2, pl.cdiv(L, _SEQ_TILE), True


def _choose_row_tile(R, tl, n_seq_blocks, itemsize):
    """Row (B*C) tile: ~2 MiB streaming input block, sublane-packing aligned."""
    sub = 8 * max(1, 4 // max(1, itemsize))       # f32 -> 8, bf16 -> 16, int8 -> 32
    target = (2 * 1024 * 1024) // (tl * itemsize)  # ~2 MiB input block
    target = max(sub, min(4096, (target // sub) * sub))
    tr = min(target, ((R + sub - 1) // sub) * sub)
    tr = max(sub, (tr // sub) * sub)
    # v7x megacore: only shrink the row tile to manufacture parallelism when the
    # sequence axis does not already provide >= 2 grid steps.
    if n_seq_blocks < 2:
        while tr > sub and pl.cdiv(R, tr) < 2:
            tr = max(sub, ((tr // 2) // sub) * sub)
    return tr


def downsample_forward(x):
    """Downsample.forward for the default config (conv_resample=False, dims=1)."""
    B, C, L = x.shape
    L_out = L // 2
    if L_out == 0:
        return jnp.zeros((B, C, 0), x.dtype)

    R = B * C
    x2 = x.reshape(R, L)  # merge of leading dims: metadata-only, no HBM pass

    tl, tl_out, n_l, needs_mask = _choose_seq_tiling(L)
    tr = _choose_row_tile(R, tl, n_l, jnp.dtype(x.dtype).itemsize)
    n_r = pl.cdiv(R, tr)

    kernel = functools.partial(_avgpool1d_kernel, tl=tl, tl_out=tl_out,
                               seq_len=L, needs_mask=needs_mask)

    out = pl.pallas_call(
        kernel,
        out_shape=jax.ShapeDtypeStruct((R, L_out), x.dtype),
        grid=(n_r, n_l),
        in_specs=[pl.BlockSpec((tr, tl), lambda i, j: (i, j))],
        out_specs=pl.BlockSpec((tr, tl_out), lambda i, j: (i, j)),
        compiler_params=pltpu.CompilerParams(
            dimension_semantics=("parallel", "parallel")),
    )(x2)

    return out.reshape(B, C, L_out)


if __name__ == "__main__":
    # Small shapes consistent with the module: x is (batch, channels, length).
    B, C, L = 2, 8, 64
    key = jax.random.PRNGKey(0)
    x = jax.random.normal(key, (B, C, L), jnp.float32)

    out = jax.block_until_ready(downsample_forward(x))

    # Pure-JAX reference of nn.AvgPool1d(kernel_size=2, stride=2).
    ref = x[:, :, : (L // 2) * 2].reshape(B, C, L // 2, 2).mean(axis=-1)
    assert out.shape == (B, C, L // 2), out.shape
    assert out.dtype == x.dtype, out.dtype
    err = float(jnp.max(jnp.abs(out - ref)))
    assert err < 1e-5, f"f32 max abs err vs reference: {err}"

    # Native-dtype path: bf16 stays bf16 end-to-end.
    xb = x.astype(jnp.bfloat16)
    outb = jax.block_until_ready(downsample_forward(xb))
    refb = (xb.astype(jnp.float32)[:, :, : (L // 2) * 2]
            .reshape(B, C, L // 2, 2).mean(axis=-1))
    assert outb.dtype == jnp.bfloat16, outb.dtype
    errb = float(jnp.max(jnp.abs(outb.astype(jnp.float32) - refb)))
    assert errb < 2e-2, f"bf16 max abs err vs reference: {errb}"

    print("KERNEL_OK")
</pallas_src>

<mosaic_0001>
module attributes {stable_mosaic.version = 11 : i64} {
  func.func @_avgpool1d_kernel(%arg0: i32, %arg1: i32, %arg2: memref<8x64xf32, #tpu.memory_space<vmem>>, %arg3: memref<8x32xf32, #tpu.memory_space<vmem>>) attributes {dimension_semantics = [#tpu.dimension_semantics<parallel>, #tpu.dimension_semantics<parallel>], iteration_bounds = array<i64: 2, 1>, scalar_prefetch = 0 : i64, scratch_operands = 0 : i64, tpu.core_type = #tpu.core_type<tc>, window_params = [{transform_indices = @transform_0, window_bounds = array<i64: 8, 64>}, {transform_indices = @transform_1, window_bounds = array<i64: 8, 32>}]} {
    %c0 = arith.constant 0 : index
    %c0_0 = arith.constant 0 : index
    %0 = vector.load %arg2[%c0, %c0_0] : memref<8x64xf32, #tpu.memory_space<vmem>>, vector<8x64xf32>
    %1 = tpu.iota {dimensions = array<i32: 0>} : vector<64x32xi32>
    %2 = tpu.iota {dimensions = array<i32: 1>} : vector<64x32xi32>
    %c2_i32 = arith.constant 2 : i32
    %3 = vector.broadcast %c2_i32 : i32 to vector<64x32xi32>
    %4 = arith.muli %3, %2 : vector<64x32xi32>
    %5 = arith.cmpi eq, %1, %4 : vector<64x32xi32>
    %c2_i32_1 = arith.constant 2 : i32
    %6 = vector.broadcast %c2_i32_1 : i32 to vector<64x32xi32>
    %7 = arith.muli %6, %2 : vector<64x32xi32>
    %c1_i32 = arith.constant 1 : i32
    %8 = vector.broadcast %c1_i32 : i32 to vector<64x32xi32>
    %9 = arith.addi %7, %8 : vector<64x32xi32>
    %10 = arith.cmpi eq, %1, %9 : vector<64x32xi32>
    %11 = arith.ori %5, %10 : vector<64x32xi1>
    %cst = arith.constant 5.000000e-01 : f32
    %cst_2 = arith.constant 0.000000e+00 : f32
    %12 = vector.broadcast %cst : f32 to vector<64x32xf32>
    %13 = vector.broadcast %cst_2 : f32 to vector<64x32xf32>
    %14 = arith.select %11, %12, %13 : vector<64x32xi1>, vector<64x32xf32>
    %cst_3 = arith.constant dense<0.000000e+00> : vector<8x32xf32>
    %15 = tpu.matmul %0, %14, %cst_3 {dimension_numbers = #tpu.dot_dimension_numbers<[1], [0], [0], [1], [0, 0, 1, 1], [], []>} : vector<8x64xf32>, vector<64x32xf32>, vector<8x32xf32> -> vector<8x32xf32>
    %c0_4 = arith.constant 0 : index
    %c0_5 = arith.constant 0 : index
    %16 = vector.load %arg3[%c0_4, %c0_5] : memref<8x32xf32, #tpu.memory_space<vmem>>, vector<8x32xf32>
    tpu.vector_store %arg3[%c0_4, %c0_5], %15 {strides = array<i32>} : memref<8x32xf32, #tpu.memory_space<vmem>>, vector<8x32xf32>,
    return
  }
  func.func @transform_0(%arg0: i32, %arg1: i32) -> (i32, i32) {
    %c0_i32 = arith.constant 0 : i32
    return %arg0, %arg1 : i32, i32
  }
  func.func @transform_1(%arg0: i32, %arg1: i32) -> (i32, i32) {
    %c0_i32 = arith.constant 0 : i32
    return %arg0, %arg1 : i32, i32
  }
}

</mosaic_0001>

<bundles_post_ra>
// kernel: tpu_custom_call.1
= control target key start
LH: loop header
LB: loop body
LE: loop exit
PB: predicated region body
PF: predicated region fallthrough
CT: control target
= control target key end

     0   :  { %6 = vsyncpa [#allocation3], 0  ;;  %s657_s0 = inlined_call_operand.hbm [shape: f32[16,64], index: 0, kind: input, shape index: {}]   ;;  %s658_s1 = inlined_call_operand.hbm [shape: f32[16,32], index: 1, kind: output, shape index: {}]  }
   0x1   :  { %8 = vsyncpa [#allocation3 + $0x1], 0 }
   0x2   :  { %9 = vsyncpa [#allocation4], 0 }
   0x3   :  { %11 = vsyncpa [#allocation4 + $0x1], 0  ;;  %s530_s6 = smov 0   ;;  %s532_s7 = smov 0  }
   0x4   :  { %s534_s8 = smov 0   ;;  %s536_s9 = smov 0  }
   0x5   :  { %s538_s10 = smov 0   ;;  %s540_s11 = smov 0  }
   0x6 LB: > { %s320_s12 = sadd.s32 4294967295, %s517_s11   ;;  %s321_s13 = sadd.s32 4294967294, %s517_s11   ;;  %s517_s11 = sphi %s540_s11, %s17_s11   ;;  %s513_s10 = sphi %s538_s10, %s667_s10   ;;  %s509_s9 = sphi %s536_s9, %s666_s9   ;;  %s505_s8 = sphi %s534_s8, %s665_s8   ;;  %s501_s7 = sphi %s532_s7, %s664_s7   ;;  %s497_s6 = sphi %s530_s6, %s663_s6  }
   0x7   : > { %s29_s14 = sadd.s32 1, %s513_s10  ;;  %s38_s15 = sadd.s32 1, %s505_s8 }
   0x8   : > { %p31_p0 = scmp.ge.s32.totalorder %s29_s14, 2  ;;  %p45_p1 = scmp.ne.s32.totalorder %s505_s8, %s501_s7 }
   0x9   : > { %p46_p2 = scmp.eq.s32.totalorder %s517_s11, 0  ;;  %p51_p3 = scmp.ne.s32.totalorder %s501_s7, %s497_s6 }
   0xa   : > { %s669_s14 = smov (%p31_p0, %s29_s14), 0  ;;  %p52_p5 = scmp.eq.s32.totalorder %s320_s12, 0 }
   0xb   : > { %p571_p4 = por %p46_p2, %p45_p1  ;;  %s33_s17 = ssub.s32 %s513_s10, %s669_s14 }
   0xc   : > { %p77_p6 = scmp.eq.s32.totalorder %s320_s12, 1  ;;  %p36_p7 = scmp.eq.s32.totalorder %s33_s17, 0 }
   0xd   : > { %p577_p8 = por %p52_p5, %p51_p3  ;;  %p83_p10 = scmp.eq.s32.totalorder %s321_s13, 1 }
   0xe   : > { %p581_p9 = por %p77_p6, %p45_p1  ;;  %p323_p12 = scmp.ge.s32.totalorder %s517_s11, 2 }
   0xf   : > { %s586_s20 = scalar_select %p36_p7, %s505_s8, %s38_s15  }
  0x10   : > { %p588_p11 = por %p83_p10, %p51_p3  ;;  %p354_p13 = scmp.lt.s32.totalorder %s517_s11, 2 }
  0x11   : > { %s103_s22 = sand.u32 1, %s505_s8   ;;  %s325_s24 = sshll.u32 %s513_s10, 3 }
  0x12   : > { %s324_s23 = sshll.u32 %s103_s22, 3  ;;  %s112_s27 = scalar_lea.hbm %s657_s0, %s325_s24 }
  0x13   : > { %s107_s28 = scalar_lea.vmem [#allocation2], %s324_s23  ;;  %s114_s30 = sshll.u32 %s112_s27, 4  ;;  %s115_s30 = int_to_ptr.hbm [resolvable:$true] %s114_s30 }
  0x14   : > { %s116_s29 = sshll.u32 %s107_s28, 4  ;;  %p347_p0 = pnand %p354_p13, %p571_p4  ;;  %s117_s29 = int_to_ptr.vmem [resolvable:$true] %s116_s29 }
  0x15   : > { %p326_p1 = scmp.ge.s32.totalorder %s517_s11, 1  ;;  %p121_p2 = scmp.lt.s32.totalorder %s517_s11, 3 }
  0x16   : > { %s104_s2 = scalar_lea.sflag [#allocation3], %s103_s22 }
  0x17   : > { %349 = dma.hbm_to_vmem [thread:$0]  (!%p347_p0), %s115_s30, 128, %s117_s29, %s104_s2  }
  0x18   : > { %p122_p3 = pnand %p326_p1, %p121_p2 }
  0x19   : > { %s604_s3 = sand.u32 (!%p122_p3), 1, %s501_s7  }
  0x1a   : > { %125 = sbr.rel (%p122_p3) target bundleno = 185 (0xb9), region = 24  ;;  %s327_s4 = sshll.u32 (!%p122_p3), %s604_s3, 3 }
  0x1b   : > { %s128_s5 = scalar_lea.sflag (!%p122_p3), [#allocation3], %s604_s3  ;;  %s610_s12 = scalar_lea.vmem (!%p122_p3), [#allocation2], %s327_s4 }
  0x1f   : > { %v152_v0 = vlaneseq }
  0x20   : > { %488 = dma.done.wait (%p577_p8), %s128_s5, 128  }
  0x21   : > { %490 = vsyncadd (%p577_p8), %s128_s5, 4294967168  ;;  %v153_v1 = vshrl.u32 %v152_v0, 7  ;;  %v162_v2 = vand.u32 127, %v152_v0  ;;  %v519_v10 = vmov 0.5   ;;  %v151_v13 = vld [vmem:[%s610_s12] sm:$0xff]  ;;  %s339_s13 = sshll.u32 %s509_s9, 3 }
  0x22   : > { %s235_s17 = scalar_lea.hbm %s658_s1, %s339_s13  ;;  %s150_s18 = scalar_lea.vmem [#allocation5], %s327_s4 }
  0x23   : > { %v160_v3 = vadd.s32 56, %v153_v1  ;;  %v163_v4 = vmul.u32 2, %v162_v2  ;;  %v159_v5 = vadd.s32 48, %v153_v1  ;;  %v158_v6 = vadd.s32 40, %v153_v1  ;;  %s237_s22 = sshll.u32 %s150_s18, 4  ;;  %s239_s23 = sshll.u32 %s235_s17, 4  ;;  %s238_s22 = int_to_ptr.vmem [resolvable:$true] %s237_s22  ;;  %s240_s23 = int_to_ptr.hbm [resolvable:$true] %s239_s23 }
  0x24   : > { %v157_v8 = vadd.s32 32, %v153_v1  ;;  %v156_v9 = vadd.s32 24, %v153_v1  ;;  %v155_v11 = vadd.s32 16, %v153_v1  ;;  %v154_v12 = vadd.s32 8, %v153_v1  ;;  %s224_s24 = scalar_lea.sflag [#allocation4], %s604_s3  ;;  %s449_s25 = sshra.s32 %s240_s23, 4  ;;  %s450_s25 = int_to_ptr.hbm [resolvable:$true] %s449_s25 }
  0x25   : > { %vm171_vm0 = vcmp.eq.s32.totalorder %v160_v3, %v163_v4  ;;  %v172_v7 = vadd.s32 1, %v163_v4  ;;  %vm170_vm1 = vcmp.eq.s32.totalorder %v159_v5, %v163_v4  ;;  %vm169_vm4 = vcmp.eq.s32.totalorder %v158_v6, %v163_v4  ;;  %s451_s26 = scalar_lea.hbm %s450_s25, 8  ;;  %s455_s28 = scalar_lea.hbm %s658_s1, 16 }
  0x26   : > { %vm168_vm8 = vcmp.eq.s32.totalorder %v157_v8, %v163_v4  ;;  %vm167_vm11 = vcmp.eq.s32.totalorder %v156_v9, %v163_v4  ;;  %vm166_vm14 = vcmp.eq.s32.totalorder %v155_v11, %v163_v4  ;;  %p452_p4 = scmp.ne.s32.totalorder %s450_s25, %s451_s26  ;;  %p456_p7 = scmp.lt.s32.totalorder %s450_s25, %s658_s1 }
  0x27   : > { %vm180_vm2 = vcmp.eq.s32.totalorder %v160_v3, %v172_v7  ;;  %vm179_vm3 = vcmp.eq.s32.totalorder %v159_v5, %v172_v7  ;;  %vm178_vm5 = vcmp.eq.s32.totalorder %v158_v6, %v172_v7  ;;  %vm177_vm9 = vcmp.eq.s32.totalorder %v157_v8, %v172_v7  ;;  %p457_p8 = scmp.lt.s32.totalorder %s455_s28, %s451_s26 }
  0x28   : > { %vm188_vm6 = vmor %vm171_vm0, %vm180_vm2  ;;  %vm176_vm12 = vcmp.eq.s32.totalorder %v156_v9, %v172_v7  ;;  %vm175_vm15 = vcmp.eq.s32.totalorder %v155_v11, %v172_v7  ;;  %vm165_vm2 = vcmp.eq.s32.totalorder %v154_v12, %v163_v4  ;;  %p453_p5 = pnand %p452_p4, %p581_p9 }
  0x29   : > { %329 = vmatpush.msk.msra.mxu0 %vm188_vm6, %v519_v10  ;;  %vm187_vm7 = vmor %vm170_vm1, %vm179_vm3  ;;  %vm174_vm6 = vcmp.eq.s32.totalorder %v154_v12, %v172_v7  ;;  %vm164_vm3 = vcmp.eq.s32.totalorder %v153_v1, %v163_v4  ;;  %p458_p10 = por %p457_p8, %p456_p7 }
  0x2a   : > { %vm186_vm10 = vmor %vm169_vm4, %vm178_vm5  ;;  %vm173_vm4 = vcmp.eq.s32.totalorder %v153_v1, %v172_v7  ;;  %p454_p6 = pneg %p453_p5 }
  0x2b   : > { %330 = vmatpush.msk.msra.mxu0 %vm187_vm7, %v519_v10  ;;  %vm185_vm13 = vmor %vm168_vm8, %vm177_vm9  ;;  %vm197_vm8 = vcmask 523264   ;;  %vm221_vm9 = vcmask 261120  }
  0x2c   : > { %vm184_vm0 = vmor %vm167_vm11, %vm176_vm12  ;;  %p459_p13 = pnand %p458_p10, %p454_p6 }
  0x2d   : > { %331 = vmatpush.msk.msra.mxu0 %vm186_vm10, %v519_v10  ;;  %vm183_vm1 = vmor %vm166_vm14, %vm175_vm15 }
  0x2e   : > { %vm182_vm5 = vmor %vm165_vm2, %vm174_vm6 }
  0x2f   : > { %332 = vmatpush.msk.msra.mxu0 %vm185_vm13, %v519_v10  ;;  %vm181_vm7 = vmor %vm164_vm3, %vm173_vm4 }
  0x31   : > { %333 = vmatpush.msk.msra.mxu0 %vm184_vm0, %v519_v10 }
  0x33   : > { %334 = vmatpush.msk.msra.mxu0 %vm183_vm1, %v519_v10 }
  0x35   : > { %335 = vmatpush.msk.msra.mxu0 %vm182_vm5, %v519_v10 }
  0x37   : > { %336 = vmatpush.msk.msra.mxu0 %vm181_vm7, %v519_v10 }
  0x38   : > { %337 = vmatmul.msk.f32.vlgmr.msra.gmra.mxu0 %vm197_vm8, %v151_v13 }
  0xb5   : > { %v218_v14 = vpop.f32.mrf.mxu0 }
  0xb6   : > { %222 = vst.msk [vmem:[%s150_s18] sm:$0xff] %vm221_vm9, %v218_v14 }
  0xb7   : > { %462 = shalt.err (!%p459_p13)
}
  0xb8   : > { %344 = dma.vmem_to_hbm [thread:$0]  (%p581_p9), %s238_s22, 128, %s240_s23, %s224_s24  }
  0xb9 PF: > { %s251_s2 = sand.u32 1, %s497_s6   ;;  %p351_p0 = pnand %p323_p12, %p588_p11 }
  0xba   : > { %s252_s3 = scalar_lea.sflag [#allocation4], %s251_s2 }
  0xbb   : > { %p352_p1 = pneg %p351_p0 }
  0xbd   : > { %492 = dma.done.wait (%p352_p1), %s252_s3, 128  }
  0xbe   : > { %494 = vsyncadd (%p352_p1), %s252_s3, 4294967168  ;;  %s17_s11 = sadd.s32 1, %s517_s11   ;;  %s663_s6 = smov %s501_s7 }
  0xbf   : > { %p14_p2 = scmp.ge.s32.totalorder %s17_s11, 4   ;;  %s664_s7 = smov %s505_s8 }
  0xc0   : > { %s665_s8 = smov %s586_s20  ;;  %s666_s9 = smov %s513_s10 }
  0xc1   : > { %s667_s10 = smov %s669_s14  ;;  %16 = sbr.rel (!%p14_p2) target bundleno = 6 (0x6), region = 69 }
  0xc6   :  { %258 = vsyncpa [#allocation3], 1 }
  0xc7   :  { %260 = vsyncpa [#allocation3 + $0x1], 1 }
  0xc8   :  { %261 = vsyncpa [#allocation4], 1 }
  0xc9   :  { %263 = vsyncpa [#allocation4 + $0x1], 1 }

</bundles_post_ra>
